<compile_context>
chip_gen: v7x
topology: tpu7x:2x2x1
jax: 0.10.0
libtpu: 0.0.40
codegen_flags: <defaults>
</compile_context>

<pallas_src>
import functools

import jax
import jax.numpy as jnp
from jax.experimental import pallas as pl
from jax.experimental.pallas import tpu as pltpu


def _shuffle_kernel_flat(x_ref, o_ref, *, groups, width):
    # x_ref: (groups, cpg_blk, W); o_ref: (cpg_blk, groups*W).
    # W % 128 == 0, so every store below is a lane-aligned dense copy.
    for j in range(groups):
        o_ref[:, j * width:(j + 1) * width] = x_ref[j]


def _shuffle_kernel_4d(x_ref, o_ref, *, groups):
    # x_ref: (groups, cpg_blk, W); o_ref: (cpg_blk, groups, W).
    # Used when W is not a multiple of 128: accepts masked sublane stores
    # instead of paying wrapper-side pad + slice HBM passes.
    for j in range(groups):
        o_ref[:, j, :] = x_ref[j]


def _pick_cpg_block(batch, groups, cpg, width, itemsize,
                    budget_bytes=3 * 1024 * 1024):
    """Largest legal cpg tile whose (groups, cpg_blk, W) slab fits the budget.

    Legal tiles: the full cpg, or any multiple-of-8 divisor of cpg (the tile is
    a second-minor block dim, so it must be a multiple of 8 or the full extent).
    When batch == 1, prefer a tile giving >= 2 grid steps so both TensorCores
    of a v7x chip get work.
    """
    cands = {cpg}
    for d in range(8, cpg, 8):
        if cpg % d == 0:
            cands.add(d)
    cands = sorted(cands, reverse=True)

    def fits(c):
        return groups * c * width * itemsize <= budget_bytes

    want_multi = (batch == 1)
    for c in cands:
        if fits(c) and (not want_multi or cpg // c >= 2):
            return c
    for c in cands:
        if fits(c):
            return c
    # Nothing fits the budget: take the smallest legal tile (may exceed budget
    # only for extreme W with small/indivisible cpg).
    return cands[-1]


def shuffle1d_pallas(x, groups):
    """Channel shuffle: x (B, C, W) -> (B, C, W) with ShuffleNet permutation."""
    B, C, W = x.shape
    if C % groups != 0:
        raise ValueError(f"num_channels={C} not divisible by groups={groups}")
    cpg = C // groups
    if groups == 1 or cpg == 1:
        return x  # permutation is the identity

    itemsize = jnp.dtype(x.dtype).itemsize
    x4 = x.reshape(B, groups, cpg, W)  # metadata-only channel split

    cpg_blk = _pick_cpg_block(B, groups, cpg, W, itemsize)
    n_c = cpg // cpg_blk
    grid = (B, n_c)

    in_spec = pl.BlockSpec((None, groups, cpg_blk, W),
                           lambda b, c: (b, 0, c, 0))

    if W % 128 == 0:
        # Fast path: flat lane-dense output (B, cpg, g*W).
        kernel = functools.partial(_shuffle_kernel_flat, groups=groups, width=W)
        out_shape = jax.ShapeDtypeStruct((B, cpg, groups * W), x.dtype)
        out_spec = pl.BlockSpec((None, cpg_blk, groups * W),
                                lambda b, c: (b, c, 0))
    else:
        # No padding / no extra HBM passes: 4-D output (B, cpg, g, W).
        kernel = functools.partial(_shuffle_kernel_4d, groups=groups)
        out_shape = jax.ShapeDtypeStruct((B, cpg, groups, W), x.dtype)
        out_spec = pl.BlockSpec((None, cpg_blk, groups, W),
                                lambda b, c: (b, c, 0, 0))

    out = pl.pallas_call(
        kernel,
        out_shape=out_shape,
        grid=grid,
        in_specs=[in_spec],
        out_specs=out_spec,
        compiler_params=pltpu.CompilerParams(
            dimension_semantics=("parallel", "parallel"),
        ),
    )(x4)

    # Metadata-only reshape back to (B, C, W) in both layouts.
    return out.reshape(B, C, W)


def shuffle1d_ref(x, groups):
    B, C, W = x.shape
    cpg = C // groups
    return x.reshape(B, groups, cpg, W).transpose(0, 2, 1, 3).reshape(B, C, W)


if __name__ == "__main__":
    key = jax.random.PRNGKey(0)
    k1, k2, k3 = jax.random.split(key, 3)

    fwd = jax.jit(shuffle1d_pallas, static_argnames="groups")

    # Main case: B=2, C=32, groups=4, W=256 (W multiple of 128 -> flat path).
    x = jax.random.normal(k1, (2, 32, 256), jnp.float32)
    y = jax.block_until_ready(fwd(x, groups=4))
    assert y.shape == x.shape
    assert bool(jnp.array_equal(y, shuffle1d_ref(x, 4))), "shuffle mismatch (main case)"

    # W not a multiple of 128, small cpg -> 4-D output path (no pad/slice).
    x2 = jax.random.normal(k2, (2, 12, 100), jnp.float32)
    y2 = jax.block_until_ready(fwd(x2, groups=3))
    assert y2.shape == x2.shape
    assert bool(jnp.array_equal(y2, shuffle1d_ref(x2, 3))), "shuffle mismatch (4-D path)"

    # B=1: cpg tile is split so the grid has >= 2 parallel steps (v7x megacore).
    x3 = jax.random.normal(k3, (1, 64, 128), jnp.float32)
    y3 = jax.block_until_ready(fwd(x3, groups=4))
    assert y3.shape == x3.shape
    assert bool(jnp.array_equal(y3, shuffle1d_ref(x3, 4))), "shuffle mismatch (B=1 case)"

    print("KERNEL_OK")
</pallas_src>

<mosaic_0001>
module attributes {stable_mosaic.version = 11 : i64} {
  func.func @_shuffle_kernel_flat(%arg0: i32, %arg1: i32, %arg2: memref<1x4x8x256xf32, #tpu.memory_space<vmem>>, %arg3: memref<1x8x1024xf32, #tpu.memory_space<vmem>>) attributes {dimension_semantics = [#tpu.dimension_semantics<parallel>, #tpu.dimension_semantics<parallel>], iteration_bounds = array<i64: 2, 1>, scalar_prefetch = 0 : i64, scratch_operands = 0 : i64, tpu.core_type = #tpu.core_type<tc>, window_params = [{transform_indices = @transform_0, window_bounds = array<i64: 1, 4, 8, 256>}, {transform_indices = @transform_1, window_bounds = array<i64: 1, 8, 1024>}]} {
    %c0 = arith.constant 0 : index
    %c0_0 = arith.constant 0 : index
    %c0_1 = arith.constant 0 : index
    %c0_2 = arith.constant 0 : index
    %0 = vector.load %arg2[%c0, %c0_0, %c0_1, %c0_2] : memref<1x4x8x256xf32, #tpu.memory_space<vmem>>, vector<1x1x8x256xf32>
    %1 = vector.shape_cast %0 : vector<1x1x8x256xf32> to vector<8x256xf32>
    %c0_3 = arith.constant 0 : index
    %c0_4 = arith.constant 0 : index
    %c0_5 = arith.constant 0 : index
    %2 = vector.load %arg3[%c0_3, %c0_4, %c0_5] : memref<1x8x1024xf32, #tpu.memory_space<vmem>>, vector<1x8x256xf32>
    %3 = vector.shape_cast %2 : vector<1x8x256xf32> to vector<8x256xf32>
    %4 = vector.shape_cast %1 : vector<8x256xf32> to vector<1x8x256xf32>
    tpu.vector_store %arg3[%c0_3, %c0_4, %c0_5], %4 {strides = array<i32>} : memref<1x8x1024xf32, #tpu.memory_space<vmem>>, vector<1x8x256xf32>,
    %c0_6 = arith.constant 0 : index
    %c1 = arith.constant 1 : index
    %c0_7 = arith.constant 0 : index
    %c0_8 = arith.constant 0 : index
    %5 = vector.load %arg2[%c0_6, %c1, %c0_7, %c0_8] : memref<1x4x8x256xf32, #tpu.memory_space<vmem>>, vector<1x1x8x256xf32>
    %6 = vector.shape_cast %5 : vector<1x1x8x256xf32> to vector<8x256xf32>
    %c0_9 = arith.constant 0 : index
    %c0_10 = arith.constant 0 : index
    %c256 = arith.constant 256 : index
    %7 = vector.load %arg3[%c0_9, %c0_10, %c256] : memref<1x8x1024xf32, #tpu.memory_space<vmem>>, vector<1x8x256xf32>
    %8 = vector.shape_cast %7 : vector<1x8x256xf32> to vector<8x256xf32>
    %9 = vector.shape_cast %6 : vector<8x256xf32> to vector<1x8x256xf32>
    tpu.vector_store %arg3[%c0_9, %c0_10, %c256], %9 {strides = array<i32>} : memref<1x8x1024xf32, #tpu.memory_space<vmem>>, vector<1x8x256xf32>,
    %c0_11 = arith.constant 0 : index
    %c2 = arith.constant 2 : index
    %c0_12 = arith.constant 0 : index
    %c0_13 = arith.constant 0 : index
    %10 = vector.load %arg2[%c0_11, %c2, %c0_12, %c0_13] : memref<1x4x8x256xf32, #tpu.memory_space<vmem>>, vector<1x1x8x256xf32>
    %11 = vector.shape_cast %10 : vector<1x1x8x256xf32> to vector<8x256xf32>
    %c0_14 = arith.constant 0 : index
    %c0_15 = arith.constant 0 : index
    %c512 = arith.constant 512 : index
    %12 = vector.load %arg3[%c0_14, %c0_15, %c512] : memref<1x8x1024xf32, #tpu.memory_space<vmem>>, vector<1x8x256xf32>
    %13 = vector.shape_cast %12 : vector<1x8x256xf32> to vector<8x256xf32>
    %14 = vector.shape_cast %11 : vector<8x256xf32> to vector<1x8x256xf32>
    tpu.vector_store %arg3[%c0_14, %c0_15, %c512], %14 {strides = array<i32>} : memref<1x8x1024xf32, #tpu.memory_space<vmem>>, vector<1x8x256xf32>,
    %c0_16 = arith.constant 0 : index
    %c3 = arith.constant 3 : index
    %c0_17 = arith.constant 0 : index
    %c0_18 = arith.constant 0 : index
    %15 = vector.load %arg2[%c0_16, %c3, %c0_17, %c0_18] : memref<1x4x8x256xf32, #tpu.memory_space<vmem>>, vector<1x1x8x256xf32>
    %16 = vector.shape_cast %15 : vector<1x1x8x256xf32> to vector<8x256xf32>
    %c0_19 = arith.constant 0 : index
    %c0_20 = arith.constant 0 : index
    %c768 = arith.constant 768 : index
    %17 = vector.load %arg3[%c0_19, %c0_20, %c768] : memref<1x8x1024xf32, #tpu.memory_space<vmem>>, vector<1x8x256xf32>
    %18 = vector.shape_cast %17 : vector<1x8x256xf32> to vector<8x256xf32>
    %19 = vector.shape_cast %16 : vector<8x256xf32> to vector<1x8x256xf32>
    tpu.vector_store %arg3[%c0_19, %c0_20, %c768], %19 {strides = array<i32>} : memref<1x8x1024xf32, #tpu.memory_space<vmem>>, vector<1x8x256xf32>,
    return
  }
  func.func @transform_0(%arg0: i32, %arg1: i32) -> (i32, i32, i32, i32) {
    %c0_i32 = arith.constant 0 : i32
    %c0_i32_0 = arith.constant 0 : i32
    %c0_i32_1 = arith.constant 0 : i32
    return %arg0, %c0_i32, %arg1, %c0_i32_0 : i32, i32, i32, i32
  }
  func.func @transform_1(%arg0: i32, %arg1: i32) -> (i32, i32, i32) {
    %c0_i32 = arith.constant 0 : i32
    %c0_i32_0 = arith.constant 0 : i32
    return %arg0, %arg1, %c0_i32 : i32, i32, i32
  }
}

</mosaic_0001>

<bundles_post_ra>
// kernel: shuffle1d_pallas.1
= control target key start
LH: loop header
LB: loop body
LE: loop exit
PB: predicated region body
PF: predicated region fallthrough
CT: control target
= control target key end

     0   :  { %6 = vsyncpa [#allocation3], 0  ;;  %s577_s0 = inlined_call_operand.hbm [shape: f32[2,4,8,256], index: 0, kind: input, shape index: {}]   ;;  %s578_s1 = inlined_call_operand.vmem [shape: f32[2,8,1024], index: 1, kind: output, shape index: {}]  }
   0x1   :  { %8 = vsyncpa [#allocation3 + $0x1], 0  ;;  %s453_s6 = smov 0   ;;  %s455_s7 = smov 0  }
   0x2   :  { %s457_s8 = smov 0   ;;  %s459_s9 = smov 0  }
   0x3   :  { %s461_s10 = smov 0   ;;  %s463_s11 = smov 0  }
   0x4 LB: > { %s280_s12 = sadd.s32 4294967295, %s438_s11   ;;  %s26_s13 = sadd.s32 1, %s434_s10  ;;  %s438_s11 = sphi %s463_s11, %s14_s11   ;;  %s434_s10 = sphi %s461_s10, %s586_s10   ;;  %s430_s9 = sphi %s459_s9, %s585_s9   ;;  %s426_s8 = sphi %s457_s8, %s584_s8   ;;  %s422_s7 = sphi %s455_s7, %s583_s7   ;;  %s418_s6 = sphi %s453_s6, %s582_s6  }
   0x5   : > { %p28_p0 = scmp.ge.s32.totalorder %s26_s13, 2  ;;  %s35_s14 = sadd.s32 1, %s426_s8 }
   0x6   : > { %p42_p1 = scmp.ne.s32.totalorder %s426_s8, %s422_s7  ;;  %p43_p2 = scmp.eq.s32.totalorder %s438_s11, 0 }
   0x7   : > { %s588_s13 = smov (%p28_p0, %s26_s13), 0  ;;  %p48_p4 = scmp.ne.s32.totalorder %s422_s7, %s418_s6 }
   0x8   : > { %p489_p3 = por %p43_p2, %p42_p1  ;;  %s30_s16 = ssub.s32 %s434_s10, %s588_s13 }
   0x9   : > { %p49_p5 = scmp.eq.s32.totalorder %s280_s12, 0  ;;  %p33_p6 = scmp.eq.s32.totalorder %s30_s16, 0 }
   0xa   : > { %p307_p8 = scmp.lt.s32.totalorder %s438_s11, 2  ;;  %s100_s19 = sand.u32 1, %s426_s8  }
   0xb   : > { %p496_p7 = por %p49_p5, %p48_p4  ;;  %s299_s20 = sshll.u32 %s434_s10, 10 }
   0xc   : > { %s502_s18 = scalar_select %p33_p6, %s426_s8, %s35_s14  }
   0xd   : > { %s284_s21 = sshll.u32 %s100_s19, 6  ;;  %s509_s24 = scalar_lea.hbm %s577_s0, %s299_s20 }
   0xe   : > { %s104_s25 = scalar_lea.vmem [#allocation2], %s284_s21  ;;  %p513_p9 = pnand %p307_p8, %p489_p3 }
   0xf   : > { %s113_s26 = sshll.u32 %s104_s25, 4  ;;  %s519_s28 = scalar_lea.sflag [#allocation3], %s100_s19  ;;  %s517_s26 = int_to_ptr.vmem [resolvable:$true] %s113_s26 }
  0x10   : > { %s358_s29 = scalar_lea.hbm %s509_s24, 1024  ;;  %p360_p11 = pneg %p513_p9 }
  0x11   : > { %p359_p10 = scmp.ne.s32.totalorder %s509_s24, %s358_s29  ;;  %s363_s3 = scalar_lea.hbm %s577_s0, 2048 }
  0x12   : > { %p364_p0 = scmp.lt.u32.totalorder %s509_s24, %s577_s0  ;;  %p365_p1 = scmp.lt.u32.totalorder %s363_s3, %s358_s29 }
  0x13   : > { %p361_p12 = pnand %p360_p11, %p359_p10  ;;  %p367_p3 = scmp.lt.u32.totalorder %s358_s29, %s509_s24 }
  0x14   : > { %p366_p2 = por %p365_p1, %p364_p0 }
  0x15   : > { %p362_p13 = pneg %p361_p12 }
  0x16   : > { %p368_p4 = por %p367_p3, %p366_p2 }
  0x18   : > { %p369_p5 = pnand %p368_p4, %p362_p13 }
  0x1a   : > { %372 = shalt.err (!%p369_p5)
}
  0x1b   : > { %s373_s6 = scalar_lea.vmem %s517_s26, 1024  ;;  %s440_s12 = smov [#allocation2]  }
  0x1c   : > { %p374_p6 = scmp.ne.s32.totalorder %s517_s26, %s373_s6  ;;  %s378_s14 = sshll.u32 %s440_s12, 4  ;;  %s379_s14 = int_to_ptr.vmem [resolvable:$false] %s378_s14 }
  0x1d   : > { %s380_s15 = scalar_lea.vmem %s379_s14, 2048  ;;  %p381_p12 = scmp.lt.s32.totalorder %s517_s26, %s379_s14 }
  0x1e   : > { %p376_p8 = pnand %p374_p6, %p360_p11  ;;  %p382_p0 = scmp.lt.s32.totalorder %s380_s15, %s373_s6 }
  0x20   : > { %p377_p10 = pneg %p376_p8  ;;  %p383_p1 = por %p382_p0, %p381_p12 }
  0x22   : > { %p384_p2 = pnand %p383_p1, %p377_p10 }
  0x24   : > { %387 = shalt.err (!%p384_p2)
}
  0x25   : > { %s441_s16 = smov 256   ;;  %s442_s19 = smov 16  }
  0x26   : > { %306 = dma.hbm_to_vmem [thread:$0]  (!%p513_p9), %s509_s24, 1024, %s517_s26, %s519_s28, %s441_s16, %s441_s16, %s442_s19  }
  0x27   : > { %p287_p11 = scmp.ge.s32.totalorder %s438_s11, 1  ;;  %p121_p13 = scmp.lt.s32.totalorder %s438_s11, 3 }
  0x29   : > { %p122_p3 = pnand %p287_p11, %p121_p13 }
  0x2a   : > { %s127_s20 = sand.u32 (!%p122_p3), 1, %s422_s7  }
  0x2b   : > { %125 = sbr.rel (%p122_p3) target bundleno = 60 (0x3c), region = 24  ;;  %s288_s21 = sshll.u32 (!%p122_p3), %s127_s20, 6 }
  0x2c   : > { %s128_s22 = scalar_lea.sflag (!%p122_p3), [#allocation3], %s127_s20  ;;  %s131_s23 = scalar_lea.vmem (!%p122_p3), [#allocation2], %s288_s21 }
  0x32   : > { %413 = dma.done.wait (%p496_p7), %s128_s22, 1024  }
  0x33   : > { %415 = vsyncadd (%p496_p7), %s128_s22, 4294966272  ;;  %p154_p4 = scmp.lt.s32.totalorder %s430_s9, 1  ;;  %v163_v0 = vld [vmem:[%s131_s23] sm:$0xff]  ;;  %v164_v1 = vld [vmem:[%s131_s23 + $0x8] sm:$0xff] }
  0x34   : > { %v291_v2 = vld [vmem:[%s131_s23 + $0x10] sm:$0xff]  ;;  %v292_v3 = vld [vmem:[%s131_s23 + $0x18] sm:$0xff]  ;;  %v293_v4 = vld [vmem:[%s131_s23 + $0x20] sm:$0xff] }
  0x35   : > { %s590_s9 = smov (!%p154_p4, %s430_s9), 1  ;;  %v294_v5 = vld [vmem:[%s131_s23 + $0x28] sm:$0xff]  ;;  %v295_v6 = vld [vmem:[%s131_s23 + $0x30] sm:$0xff]  ;;  %v296_v7 = vld [vmem:[%s131_s23 + $0x38] sm:$0xff] }
  0x36   : > { %s300_s24 = sshll.u32 %s590_s9, 6 }
  0x37   : > { %s162_s27 = scalar_lea.vmem %s578_s1, %s300_s24 }
  0x38   : > { %165 = vst [vmem:[%s162_s27] sm:$0xff] %v163_v0  ;;  %166 = vst [vmem:[%s162_s27 + $0x8] sm:$0xff] %v164_v1 }
  0x39   : > { %170 = vst [vmem:[%s162_s27 + $0x10] sm:$0xff] %v291_v2  ;;  %171 = vst [vmem:[%s162_s27 + $0x18] sm:$0xff] %v292_v3 }
  0x3a   : > { %175 = vst [vmem:[%s162_s27 + $0x20] sm:$0xff] %v293_v4  ;;  %176 = vst [vmem:[%s162_s27 + $0x28] sm:$0xff] %v294_v5 }
  0x3b   : > { %180 = vst [vmem:[%s162_s27 + $0x30] sm:$0xff] %v295_v6  ;;  %181 = vst [vmem:[%s162_s27 + $0x38] sm:$0xff] %v296_v7 }
  0x3c PF: > { %s14_s11 = sadd.s32 1, %s438_s11   ;;  %s582_s6 = smov %s422_s7 }
  0x3d   : > { %p11_p7 = scmp.ge.s32.totalorder %s14_s11, 4   ;;  %s583_s7 = smov %s426_s8 }
  0x3e   : > { %s584_s8 = smov %s502_s18  ;;  %s585_s9 = smov %s434_s10 }
  0x3f   : > { %s586_s10 = smov %s588_s13  ;;  %13 = sbr.rel (!%p11_p7) target bundleno = 4 (0x4), region = 67 }
  0x46   :  { %211 = vsyncpa [#allocation3], 1 }
  0x47   :  { %213 = vsyncpa [#allocation3 + $0x1], 1 }

</bundles_post_ra>
